<compile_context>
chip_gen: v7x
topology: tpu7x:2x2x1
jax: 0.10.0
libtpu: 0.0.40
codegen_flags: <defaults>
</compile_context>

<pallas_src>
import functools

import numpy as np
import jax
import jax.numpy as jnp
from jax.experimental import pallas as pl
from jax.experimental.pallas import tpu as pltpu

# ----------------------------- static config --------------------------------
CLOTH_TYPES = ['hair', 'uppercloth', 'coat', 'pants', 'skirts', 'shoes']
DP_PARTS = {
    'head': [22, 23],
    'upperbody': [0, 1, 14, 15, 16, 17, 18, 19, 20, 21],
    'lowerbody': [6, 7, 8, 9, 10, 11, 12, 13],
    'foot': [4, 5],
}
PART_CLOTHES = {
    'head': ['hair'],
    'upperbody': ['uppercloth', 'coat'],
    'lowerbody': ['pants', 'skirts'],
    'foot': ['shoes'],
}
NUM_PATCH = 24                       # densepose patch ids live in [0, 24)
C = len(CLOTH_TYPES)
PART_NAMES = list(DP_PARTS.keys())
NUM_PARTS = len(PART_NAMES)

# Packed-bitfield widths (counts per field must not overflow):
PART_BITS = 7                        # 4 parts * 7 bits = 28 bits  -> P <= 127
CLOTH_BITS = 5                       # 6 types * 5 bits = 30 bits  -> Q <= 31


def _contiguous_ranges(ids):
    """Compress a sorted id list into inclusive (lo, hi) ranges."""
    ids = sorted(ids)
    out = []
    lo = prev = ids[0]
    for v in ids[1:]:
        if v == prev + 1:
            prev = v
        else:
            out.append((lo, prev))
            lo = prev = v
    out.append((lo, prev))
    return out


# Compile-time constants baked into the kernel (no DMA'd map input).
PART_RANGES = [_contiguous_ranges(DP_PARTS[p]) for p in PART_NAMES]
CLOTH_TO_PART = []
for _cl in CLOTH_TYPES:
    for _b, _part in enumerate(PART_NAMES):
        if _cl in PART_CLOTHES[_part]:
            CLOTH_TO_PART.append(_b)
            break
assert len(CLOTH_TO_PART) == C


# ------------------------------ Pallas kernel --------------------------------
def cloth_cls_loss_kernel(out_ref, patch_ref, cloth_ref,
                          gt_ref, loss_ref, cnt_ref, *, total_b):
    p = out_ref[...]                              # (C, TB) f32, batch on lanes
    patch = patch_ref[...]                        # (P, TB) i32
    cloth = cloth_ref[...]                        # (Q, TB) i32
    Cc, TB = p.shape

    # ---- part-presence: pack per-row part membership into 7-bit count fields
    #      and reduce once over the P (sublane) axis.                     ----
    part_rows = jnp.zeros(patch.shape, jnp.int32)
    for b, ranges in enumerate(PART_RANGES):      # static unroll, 4 parts
        in_part = None
        for lo, hi in ranges:                     # static unroll, <=2 ranges
            r = jnp.logical_and(patch >= lo, patch <= hi)
            in_part = r if in_part is None else jnp.logical_or(in_part, r)
        part_rows = part_rows + jnp.where(in_part,
                                          jnp.int32(1 << (PART_BITS * b)), 0)
    part_code = jnp.sum(part_rows, axis=0, keepdims=True)       # (1, TB)

    # ---- cloth labels: pack per-row one-hot into 5-bit count fields and
    #      reduce once over the Q (sublane) axis.                          ----
    cloth_rows = jnp.zeros(cloth.shape, jnp.int32)
    for ci in range(Cc):                          # static unroll, 6 types
        cloth_rows = cloth_rows + jnp.where(cloth == ci + 1,
                                            jnp.int32(1 << (CLOTH_BITS * ci)), 0)
    cloth_code = jnp.sum(cloth_rows, axis=0, keepdims=True)     # (1, TB)

    # ---- expand packed codes to (C, TB) with per-row static field masks ----
    row = jax.lax.broadcasted_iota(jnp.int32, (Cc, TB), 0)      # cloth id/row
    gt_mask = jnp.zeros((Cc, TB), jnp.int32)
    valid_mask = jnp.zeros((Cc, TB), jnp.int32)
    for ci in range(Cc):                          # static unroll, constants
        gt_mask = jnp.where(row == ci,
                            jnp.int32(((1 << CLOTH_BITS) - 1) << (CLOTH_BITS * ci)),
                            gt_mask)
        valid_mask = jnp.where(row == ci,
                               jnp.int32(((1 << PART_BITS) - 1)
                                         << (PART_BITS * CLOTH_TO_PART[ci])),
                               valid_mask)

    index_gt_b = (jnp.broadcast_to(cloth_code, (Cc, TB)) & gt_mask) != 0
    valid_b = (jnp.broadcast_to(part_code, (Cc, TB)) & valid_mask) != 0

    # ---- BCE with a single EUP log (index_gt is exactly 0/1), clamp -100 ----
    sel = jnp.where(index_gt_b, p, 1.0 - p)
    bce = -jnp.maximum(jnp.log(sel), -100.0)                    # (C, TB)

    # ---- ragged last tile: mask lanes past the true batch size ----
    if total_b % TB != 0:
        step = pl.program_id(0)
        col = step * TB + jax.lax.broadcasted_iota(jnp.int32, (Cc, TB), 1)
        mask = jnp.logical_and(valid_b, col < total_b)
    else:
        mask = valid_b

    # ---- outputs: lane-dense index_gt + per-tile partial sums ----
    gt_ref[...] = index_gt_b.astype(jnp.float32)
    loss_part = jnp.sum(jnp.where(mask, bce, 0.0))
    cnt_part = jnp.sum(mask.astype(jnp.float32))
    loss_ref[...] = jnp.full(loss_ref.shape, loss_part, jnp.float32)
    cnt_ref[...] = jnp.full(cnt_ref.shape, cnt_part, jnp.float32)


def cloth_cls_loss(out, patch_idx, cloth_idx):
    out = jnp.asarray(out, jnp.float32)
    patch_idx = jnp.asarray(patch_idx, jnp.int32)
    cloth_idx = jnp.asarray(cloth_idx, jnp.int32)

    B, Cc = out.shape
    P = patch_idx.shape[1]
    Q = cloth_idx.shape[1]
    assert Cc == C
    # Packed-count field widths must hold the per-field counts.
    # TODO(synk): widen fields / split packing if P > 127 or Q > 31.
    assert P <= (1 << PART_BITS) - 1 and Q <= (1 << CLOTH_BITS) - 1

    # Lane-dense layout: batch on the last (lane) axis.  Tiny XLA transposes.
    out_t = out.T            # (C, B)
    patch_t = patch_idx.T    # (P, B)
    cloth_t = cloth_idx.T    # (Q, B)

    # Batch tile: one grid step up to 32768 lanes; bigger batches tile by a
    # multiple of 128 lanes (ragged last tile masked in-kernel, no padding).
    MAX_TB = 32768
    if B <= MAX_TB:
        TB, G = B, 1
    else:
        TB = MAX_TB
        G = (B + TB - 1) // TB

    kernel = functools.partial(cloth_cls_loss_kernel, total_b=B)

    gt_t, loss_part, cnt_part = pl.pallas_call(
        kernel,
        grid=(G,),
        in_specs=[
            pl.BlockSpec((Cc, TB), lambda i: (0, i)),
            pl.BlockSpec((P, TB), lambda i: (0, i)),
            pl.BlockSpec((Q, TB), lambda i: (0, i)),
        ],
        out_specs=(
            pl.BlockSpec((Cc, TB), lambda i: (0, i)),        # index_gt (C, B)
            pl.BlockSpec((1, 8, 128), lambda i: (i, 0, 0)),  # loss partials
            pl.BlockSpec((1, 8, 128), lambda i: (i, 0, 0)),  # count partials
        ),
        out_shape=(
            jax.ShapeDtypeStruct((Cc, B), jnp.float32),
            jax.ShapeDtypeStruct((G, 8, 128), jnp.float32),
            jax.ShapeDtypeStruct((G, 8, 128), jnp.float32),
        ),
        compiler_params=pltpu.CompilerParams(
            dimension_semantics=("parallel",)),   # no carried state across tiles
    )(out_t, patch_t, cloth_t)

    loss_sum = jnp.sum(loss_part[:, 0, 0])
    valid_cnt = jnp.sum(cnt_part[:, 0, 0])
    # NaN when no entry is valid, matching torch `loss[valid>0].mean()`.
    loss = loss_sum / valid_cnt
    return loss, gt_t.T


# ------------------------------ reference (numpy) -----------------------------
def reference(out, patch_idx, cloth_idx):
    out = np.asarray(out); patch_idx = np.asarray(patch_idx)
    cloth_idx = np.asarray(cloth_idx)
    B = out.shape[0]
    valid = np.zeros_like(out)
    index_gt = np.zeros_like(out)
    for part in DP_PARTS:
        vop = np.zeros((B,), dtype=np.float32)
        for pidx in DP_PARTS[part]:
            vop += (patch_idx == pidx).any(1)
        for cloth in PART_CLOTHES[part]:
            if cloth in CLOTH_TYPES:
                valid[vop > 0, CLOTH_TYPES.index(cloth)] = 1
    for idx in range(C):
        index_gt[:, idx] += (cloth_idx == idx + 1).any(1)
    bce = -(index_gt * np.maximum(np.log(out), -100.0)
            + (1 - index_gt) * np.maximum(np.log(1 - out), -100.0))
    sel = bce[valid > 0]
    return sel.mean(), index_gt


# ------------------------------------ main ------------------------------------
if __name__ == "__main__":
    B, P, Q = 8, 16, 8
    key = jax.random.PRNGKey(0)
    k1, k2, k3 = jax.random.split(key, 3)

    out = jax.nn.sigmoid(jax.random.normal(k1, (B, C), dtype=jnp.float32))
    patch_idx = jax.random.randint(k2, (B, P), 0, NUM_PATCH, dtype=jnp.int32)
    cloth_idx = jax.random.randint(k3, (B, Q), 0, C + 1, dtype=jnp.int32)

    loss, index_gt = cloth_cls_loss(out, patch_idx, cloth_idx)
    jax.block_until_ready((loss, index_gt))

    ref_loss, ref_gt = reference(out, patch_idx, cloth_idx)
    assert np.allclose(np.asarray(index_gt), ref_gt), "index_gt mismatch"
    assert np.allclose(float(loss), float(ref_loss), rtol=1e-5, atol=1e-6), \
        "loss mismatch"

    print("KERNEL_OK")
</pallas_src>

<mosaic_0001>
module attributes {stable_mosaic.version = 11 : i64} {
  func.func @cloth_cls_loss_kernel(%arg0: i32, %arg1: memref<6x8xf32, #tpu.memory_space<vmem>>, %arg2: memref<16x8xi32, #tpu.memory_space<vmem>>, %arg3: memref<8x8xi32, #tpu.memory_space<vmem>>, %arg4: memref<6x8xf32, #tpu.memory_space<vmem>>, %arg5: memref<1x8x128xf32, #tpu.memory_space<vmem>>, %arg6: memref<1x8x128xf32, #tpu.memory_space<vmem>>) attributes {dimension_semantics = [#tpu.dimension_semantics<parallel>], iteration_bounds = array<i64: 1>, scalar_prefetch = 0 : i64, scratch_operands = 0 : i64, tpu.core_type = #tpu.core_type<tc>, window_params = [{transform_indices = @transform_0, window_bounds = array<i64: 6, 8>}, {transform_indices = @transform_1, window_bounds = array<i64: 16, 8>}, {transform_indices = @transform_2, window_bounds = array<i64: 8, 8>}, {transform_indices = @transform_3, window_bounds = array<i64: 6, 8>}, {transform_indices = @transform_4, window_bounds = array<i64: 1, 8, 128>}, {transform_indices = @transform_5, window_bounds = array<i64: 1, 8, 128>}]} {
    %c0 = arith.constant 0 : index
    %c0_0 = arith.constant 0 : index
    %0 = vector.load %arg1[%c0, %c0_0] : memref<6x8xf32, #tpu.memory_space<vmem>>, vector<6x8xf32>
    %c0_1 = arith.constant 0 : index
    %c0_2 = arith.constant 0 : index
    %1 = vector.load %arg2[%c0_1, %c0_2] : memref<16x8xi32, #tpu.memory_space<vmem>>, vector<16x8xi32>
    %c0_3 = arith.constant 0 : index
    %c0_4 = arith.constant 0 : index
    %2 = vector.load %arg3[%c0_3, %c0_4] : memref<8x8xi32, #tpu.memory_space<vmem>>, vector<8x8xi32>
    %c0_i32 = arith.constant 0 : i32
    %3 = vector.broadcast %c0_i32 : i32 to vector<16x8xi32>
    %c22_i32 = arith.constant 22 : i32
    %4 = vector.broadcast %c22_i32 : i32 to vector<16x8xi32>
    %5 = arith.cmpi sge, %1, %4 : vector<16x8xi32>
    %c23_i32 = arith.constant 23 : i32
    %6 = vector.broadcast %c23_i32 : i32 to vector<16x8xi32>
    %7 = arith.cmpi sle, %1, %6 : vector<16x8xi32>
    %8 = arith.andi %5, %7 : vector<16x8xi1>
    %c1_i32 = arith.constant 1 : i32
    %c0_i32_5 = arith.constant 0 : i32
    %9 = vector.broadcast %c1_i32 : i32 to vector<16x8xi32>
    %10 = vector.broadcast %c0_i32_5 : i32 to vector<16x8xi32>
    %11 = arith.select %8, %9, %10 : vector<16x8xi1>, vector<16x8xi32>
    %12 = arith.addi %3, %11 : vector<16x8xi32>
    %c0_i32_6 = arith.constant 0 : i32
    %13 = vector.broadcast %c0_i32_6 : i32 to vector<16x8xi32>
    %14 = arith.cmpi sge, %1, %13 : vector<16x8xi32>
    %c1_i32_7 = arith.constant 1 : i32
    %15 = vector.broadcast %c1_i32_7 : i32 to vector<16x8xi32>
    %16 = arith.cmpi sle, %1, %15 : vector<16x8xi32>
    %17 = arith.andi %14, %16 : vector<16x8xi1>
    %c14_i32 = arith.constant 14 : i32
    %18 = vector.broadcast %c14_i32 : i32 to vector<16x8xi32>
    %19 = arith.cmpi sge, %1, %18 : vector<16x8xi32>
    %c21_i32 = arith.constant 21 : i32
    %20 = vector.broadcast %c21_i32 : i32 to vector<16x8xi32>
    %21 = arith.cmpi sle, %1, %20 : vector<16x8xi32>
    %22 = arith.andi %19, %21 : vector<16x8xi1>
    %23 = arith.ori %17, %22 : vector<16x8xi1>
    %c128_i32 = arith.constant 128 : i32
    %c0_i32_8 = arith.constant 0 : i32
    %24 = vector.broadcast %c128_i32 : i32 to vector<16x8xi32>
    %25 = vector.broadcast %c0_i32_8 : i32 to vector<16x8xi32>
    %26 = arith.select %23, %24, %25 : vector<16x8xi1>, vector<16x8xi32>
    %27 = arith.addi %12, %26 : vector<16x8xi32>
    %c6_i32 = arith.constant 6 : i32
    %28 = vector.broadcast %c6_i32 : i32 to vector<16x8xi32>
    %29 = arith.cmpi sge, %1, %28 : vector<16x8xi32>
    %c13_i32 = arith.constant 13 : i32
    %30 = vector.broadcast %c13_i32 : i32 to vector<16x8xi32>
    %31 = arith.cmpi sle, %1, %30 : vector<16x8xi32>
    %32 = arith.andi %29, %31 : vector<16x8xi1>
    %c16384_i32 = arith.constant 16384 : i32
    %c0_i32_9 = arith.constant 0 : i32
    %33 = vector.broadcast %c16384_i32 : i32 to vector<16x8xi32>
    %34 = vector.broadcast %c0_i32_9 : i32 to vector<16x8xi32>
    %35 = arith.select %32, %33, %34 : vector<16x8xi1>, vector<16x8xi32>
    %36 = arith.addi %27, %35 : vector<16x8xi32>
    %c4_i32 = arith.constant 4 : i32
    %37 = vector.broadcast %c4_i32 : i32 to vector<16x8xi32>
    %38 = arith.cmpi sge, %1, %37 : vector<16x8xi32>
    %c5_i32 = arith.constant 5 : i32
    %39 = vector.broadcast %c5_i32 : i32 to vector<16x8xi32>
    %40 = arith.cmpi sle, %1, %39 : vector<16x8xi32>
    %41 = arith.andi %38, %40 : vector<16x8xi1>
    %c2097152_i32 = arith.constant 2097152 : i32
    %c0_i32_10 = arith.constant 0 : i32
    %42 = vector.broadcast %c2097152_i32 : i32 to vector<16x8xi32>
    %43 = vector.broadcast %c0_i32_10 : i32 to vector<16x8xi32>
    %44 = arith.select %41, %42, %43 : vector<16x8xi1>, vector<16x8xi32>
    %45 = arith.addi %36, %44 : vector<16x8xi32>
    %cst = arith.constant dense<0> : vector<8xi32>
    %46 = vector.multi_reduction <add>, %45, %cst [0] : vector<16x8xi32> to vector<8xi32>
    %47 = vector.shape_cast %46 : vector<8xi32> to vector<1x8xi32>
    %c0_i32_11 = arith.constant 0 : i32
    %48 = vector.broadcast %c0_i32_11 : i32 to vector<8x8xi32>
    %c1_i32_12 = arith.constant 1 : i32
    %49 = vector.broadcast %c1_i32_12 : i32 to vector<8x8xi32>
    %50 = arith.cmpi eq, %2, %49 : vector<8x8xi32>
    %c1_i32_13 = arith.constant 1 : i32
    %c0_i32_14 = arith.constant 0 : i32
    %51 = vector.broadcast %c1_i32_13 : i32 to vector<8x8xi32>
    %52 = vector.broadcast %c0_i32_14 : i32 to vector<8x8xi32>
    %53 = arith.select %50, %51, %52 : vector<8x8xi1>, vector<8x8xi32>
    %54 = arith.addi %48, %53 : vector<8x8xi32>
    %c2_i32 = arith.constant 2 : i32
    %55 = vector.broadcast %c2_i32 : i32 to vector<8x8xi32>
    %56 = arith.cmpi eq, %2, %55 : vector<8x8xi32>
    %c32_i32 = arith.constant 32 : i32
    %c0_i32_15 = arith.constant 0 : i32
    %57 = vector.broadcast %c32_i32 : i32 to vector<8x8xi32>
    %58 = vector.broadcast %c0_i32_15 : i32 to vector<8x8xi32>
    %59 = arith.select %56, %57, %58 : vector<8x8xi1>, vector<8x8xi32>
    %60 = arith.addi %54, %59 : vector<8x8xi32>
    %c3_i32 = arith.constant 3 : i32
    %61 = vector.broadcast %c3_i32 : i32 to vector<8x8xi32>
    %62 = arith.cmpi eq, %2, %61 : vector<8x8xi32>
    %c1024_i32 = arith.constant 1024 : i32
    %c0_i32_16 = arith.constant 0 : i32
    %63 = vector.broadcast %c1024_i32 : i32 to vector<8x8xi32>
    %64 = vector.broadcast %c0_i32_16 : i32 to vector<8x8xi32>
    %65 = arith.select %62, %63, %64 : vector<8x8xi1>, vector<8x8xi32>
    %66 = arith.addi %60, %65 : vector<8x8xi32>
    %c4_i32_17 = arith.constant 4 : i32
    %67 = vector.broadcast %c4_i32_17 : i32 to vector<8x8xi32>
    %68 = arith.cmpi eq, %2, %67 : vector<8x8xi32>
    %c32768_i32 = arith.constant 32768 : i32
    %c0_i32_18 = arith.constant 0 : i32
    %69 = vector.broadcast %c32768_i32 : i32 to vector<8x8xi32>
    %70 = vector.broadcast %c0_i32_18 : i32 to vector<8x8xi32>
    %71 = arith.select %68, %69, %70 : vector<8x8xi1>, vector<8x8xi32>
    %72 = arith.addi %66, %71 : vector<8x8xi32>
    %c5_i32_19 = arith.constant 5 : i32
    %73 = vector.broadcast %c5_i32_19 : i32 to vector<8x8xi32>
    %74 = arith.cmpi eq, %2, %73 : vector<8x8xi32>
    %c1048576_i32 = arith.constant 1048576 : i32
    %c0_i32_20 = arith.constant 0 : i32
    %75 = vector.broadcast %c1048576_i32 : i32 to vector<8x8xi32>
    %76 = vector.broadcast %c0_i32_20 : i32 to vector<8x8xi32>
    %77 = arith.select %74, %75, %76 : vector<8x8xi1>, vector<8x8xi32>
    %78 = arith.addi %72, %77 : vector<8x8xi32>
    %c6_i32_21 = arith.constant 6 : i32
    %79 = vector.broadcast %c6_i32_21 : i32 to vector<8x8xi32>
    %80 = arith.cmpi eq, %2, %79 : vector<8x8xi32>
    %c33554432_i32 = arith.constant 33554432 : i32
    %c0_i32_22 = arith.constant 0 : i32
    %81 = vector.broadcast %c33554432_i32 : i32 to vector<8x8xi32>
    %82 = vector.broadcast %c0_i32_22 : i32 to vector<8x8xi32>
    %83 = arith.select %80, %81, %82 : vector<8x8xi1>, vector<8x8xi32>
    %84 = arith.addi %78, %83 : vector<8x8xi32>
    %cst_23 = arith.constant dense<0> : vector<8xi32>
    %85 = vector.multi_reduction <add>, %84, %cst_23 [0] : vector<8x8xi32> to vector<8xi32>
    %86 = vector.shape_cast %85 : vector<8xi32> to vector<1x8xi32>
    %87 = tpu.iota {dimensions = array<i32: 0>} : vector<6x8xi32>
    %c0_i32_24 = arith.constant 0 : i32
    %88 = vector.broadcast %c0_i32_24 : i32 to vector<6x8xi32>
    %c0_i32_25 = arith.constant 0 : i32
    %89 = vector.broadcast %c0_i32_25 : i32 to vector<6x8xi32>
    %c0_i32_26 = arith.constant 0 : i32
    %90 = vector.broadcast %c0_i32_26 : i32 to vector<6x8xi32>
    %91 = arith.cmpi eq, %87, %90 : vector<6x8xi32>
    %c31_i32 = arith.constant 31 : i32
    %92 = vector.broadcast %c31_i32 : i32 to vector<6x8xi32>
    %93 = arith.select %91, %92, %88 : vector<6x8xi1>, vector<6x8xi32>
    %c0_i32_27 = arith.constant 0 : i32
    %94 = vector.broadcast %c0_i32_27 : i32 to vector<6x8xi32>
    %95 = arith.cmpi eq, %87, %94 : vector<6x8xi32>
    %c127_i32 = arith.constant 127 : i32
    %96 = vector.broadcast %c127_i32 : i32 to vector<6x8xi32>
    %97 = arith.select %95, %96, %89 : vector<6x8xi1>, vector<6x8xi32>
    %c1_i32_28 = arith.constant 1 : i32
    %98 = vector.broadcast %c1_i32_28 : i32 to vector<6x8xi32>
    %99 = arith.cmpi eq, %87, %98 : vector<6x8xi32>
    %c992_i32 = arith.constant 992 : i32
    %100 = vector.broadcast %c992_i32 : i32 to vector<6x8xi32>
    %101 = arith.select %99, %100, %93 : vector<6x8xi1>, vector<6x8xi32>
    %c1_i32_29 = arith.constant 1 : i32
    %102 = vector.broadcast %c1_i32_29 : i32 to vector<6x8xi32>
    %103 = arith.cmpi eq, %87, %102 : vector<6x8xi32>
    %c16256_i32 = arith.constant 16256 : i32
    %104 = vector.broadcast %c16256_i32 : i32 to vector<6x8xi32>
    %105 = arith.select %103, %104, %97 : vector<6x8xi1>, vector<6x8xi32>
    %c2_i32_30 = arith.constant 2 : i32
    %106 = vector.broadcast %c2_i32_30 : i32 to vector<6x8xi32>
    %107 = arith.cmpi eq, %87, %106 : vector<6x8xi32>
    %c31744_i32 = arith.constant 31744 : i32
    %108 = vector.broadcast %c31744_i32 : i32 to vector<6x8xi32>
    %109 = arith.select %107, %108, %101 : vector<6x8xi1>, vector<6x8xi32>
    %c2_i32_31 = arith.constant 2 : i32
    %110 = vector.broadcast %c2_i32_31 : i32 to vector<6x8xi32>
    %111 = arith.cmpi eq, %87, %110 : vector<6x8xi32>
    %c16256_i32_32 = arith.constant 16256 : i32
    %112 = vector.broadcast %c16256_i32_32 : i32 to vector<6x8xi32>
    %113 = arith.select %111, %112, %105 : vector<6x8xi1>, vector<6x8xi32>
    %c3_i32_33 = arith.constant 3 : i32
    %114 = vector.broadcast %c3_i32_33 : i32 to vector<6x8xi32>
    %115 = arith.cmpi eq, %87, %114 : vector<6x8xi32>
    %c1015808_i32 = arith.constant 1015808 : i32
    %116 = vector.broadcast %c1015808_i32 : i32 to vector<6x8xi32>
    %117 = arith.select %115, %116, %109 : vector<6x8xi1>, vector<6x8xi32>
    %c3_i32_34 = arith.constant 3 : i32
    %118 = vector.broadcast %c3_i32_34 : i32 to vector<6x8xi32>
    %119 = arith.cmpi eq, %87, %118 : vector<6x8xi32>
    %c2080768_i32 = arith.constant 2080768 : i32
    %120 = vector.broadcast %c2080768_i32 : i32 to vector<6x8xi32>
    %121 = arith.select %119, %120, %113 : vector<6x8xi1>, vector<6x8xi32>
    %c4_i32_35 = arith.constant 4 : i32
    %122 = vector.broadcast %c4_i32_35 : i32 to vector<6x8xi32>
    %123 = arith.cmpi eq, %87, %122 : vector<6x8xi32>
    %c32505856_i32 = arith.constant 32505856 : i32
    %124 = vector.broadcast %c32505856_i32 : i32 to vector<6x8xi32>
    %125 = arith.select %123, %124, %117 : vector<6x8xi1>, vector<6x8xi32>
    %c4_i32_36 = arith.constant 4 : i32
    %126 = vector.broadcast %c4_i32_36 : i32 to vector<6x8xi32>
    %127 = arith.cmpi eq, %87, %126 : vector<6x8xi32>
    %c2080768_i32_37 = arith.constant 2080768 : i32
    %128 = vector.broadcast %c2080768_i32_37 : i32 to vector<6x8xi32>
    %129 = arith.select %127, %128, %121 : vector<6x8xi1>, vector<6x8xi32>
    %c5_i32_38 = arith.constant 5 : i32
    %130 = vector.broadcast %c5_i32_38 : i32 to vector<6x8xi32>
    %131 = arith.cmpi eq, %87, %130 : vector<6x8xi32>
    %c1040187392_i32 = arith.constant 1040187392 : i32
    %132 = vector.broadcast %c1040187392_i32 : i32 to vector<6x8xi32>
    %133 = arith.select %131, %132, %125 : vector<6x8xi1>, vector<6x8xi32>
    %c5_i32_39 = arith.constant 5 : i32
    %134 = vector.broadcast %c5_i32_39 : i32 to vector<6x8xi32>
    %135 = arith.cmpi eq, %87, %134 : vector<6x8xi32>
    %c266338304_i32 = arith.constant 266338304 : i32
    %136 = vector.broadcast %c266338304_i32 : i32 to vector<6x8xi32>
    %137 = arith.select %135, %136, %129 : vector<6x8xi1>, vector<6x8xi32>
    %138 = vector.shape_cast %86 : vector<1x8xi32> to vector<1x8xi32>
    %139 = vector.broadcast %138 : vector<1x8xi32> to vector<6x8xi32>
    %140 = arith.andi %139, %133 : vector<6x8xi32>
    %c0_i32_40 = arith.constant 0 : i32
    %141 = vector.broadcast %c0_i32_40 : i32 to vector<6x8xi32>
    %142 = arith.cmpi ne, %140, %141 : vector<6x8xi32>
    %143 = vector.shape_cast %47 : vector<1x8xi32> to vector<1x8xi32>
    %144 = vector.broadcast %143 : vector<1x8xi32> to vector<6x8xi32>
    %145 = arith.andi %144, %137 : vector<6x8xi32>
    %c0_i32_41 = arith.constant 0 : i32
    %146 = vector.broadcast %c0_i32_41 : i32 to vector<6x8xi32>
    %147 = arith.cmpi ne, %145, %146 : vector<6x8xi32>
    %cst_42 = arith.constant 1.000000e+00 : f32
    %148 = vector.broadcast %cst_42 : f32 to vector<6x8xf32>
    %149 = arith.subf %148, %0 : vector<6x8xf32>
    %150 = arith.select %142, %0, %149 : vector<6x8xi1>, vector<6x8xf32>
    %151 = math.log %150 : vector<6x8xf32>
    %cst_43 = arith.constant -1.000000e+02 : f32
    %152 = vector.broadcast %cst_43 : f32 to vector<6x8xf32>
    %153 = arith.maximumf %151, %152 : vector<6x8xf32>
    %cst_44 = arith.constant 0.000000e+00 : f32
    %154 = vector.broadcast %cst_44 : f32 to vector<6x8xf32>
    %155 = arith.subf %154, %153 : vector<6x8xf32>
    %156 = arith.extui %142 : vector<6x8xi1> to vector<6x8xi32>
    %157 = arith.sitofp %156 : vector<6x8xi32> to vector<6x8xf32>
    %c0_45 = arith.constant 0 : index
    %c0_46 = arith.constant 0 : index
    %158 = vector.load %arg4[%c0_45, %c0_46] : memref<6x8xf32, #tpu.memory_space<vmem>>, vector<6x8xf32>
    tpu.vector_store %arg4[%c0_45, %c0_46], %157 {strides = array<i32>} : memref<6x8xf32, #tpu.memory_space<vmem>>, vector<6x8xf32>,
    %cst_47 = arith.constant 0.000000e+00 : f32
    %159 = vector.broadcast %cst_47 : f32 to vector<6x8xf32>
    %160 = arith.select %147, %155, %159 : vector<6x8xi1>, vector<6x8xf32>
    %161 = vector.shape_cast %160 : vector<6x8xf32> to vector<1x6x8xf32>
    %cst_48 = arith.constant dense<0.000000e+00> : vector<1xf32>
    %162 = vector.multi_reduction <add>, %161, %cst_48 [1, 2] : vector<1x6x8xf32> to vector<1xf32>
    %163 = vector.shape_cast %162 : vector<1xf32> to vector<1x1x1xf32>
    %164 = vector.extract %163[0, 0, 0] : f32 from vector<1x1x1xf32>
    %165 = arith.extui %147 : vector<6x8xi1> to vector<6x8xi32>
    %166 = arith.sitofp %165 : vector<6x8xi32> to vector<6x8xf32>
    %167 = vector.shape_cast %166 : vector<6x8xf32> to vector<1x6x8xf32>
    %cst_49 = arith.constant dense<0.000000e+00> : vector<1xf32>
    %168 = vector.multi_reduction <add>, %167, %cst_49 [1, 2] : vector<1x6x8xf32> to vector<1xf32>
    %169 = vector.shape_cast %168 : vector<1xf32> to vector<1x1x1xf32>
    %170 = vector.extract %169[0, 0, 0] : f32 from vector<1x1x1xf32>
    %171 = vector.broadcast %164 : f32 to vector<1x8x128xf32>
    %c0_50 = arith.constant 0 : index
    %c0_51 = arith.constant 0 : index
    %c0_52 = arith.constant 0 : index
    %172 = vector.load %arg5[%c0_50, %c0_51, %c0_52] : memref<1x8x128xf32, #tpu.memory_space<vmem>>, vector<1x8x128xf32>
    tpu.vector_store %arg5[%c0_50, %c0_51, %c0_52], %171 {strides = array<i32>} : memref<1x8x128xf32, #tpu.memory_space<vmem>>, vector<1x8x128xf32>,
    %173 = vector.broadcast %170 : f32 to vector<1x8x128xf32>
    %c0_53 = arith.constant 0 : index
    %c0_54 = arith.constant 0 : index
    %c0_55 = arith.constant 0 : index
    %174 = vector.load %arg6[%c0_53, %c0_54, %c0_55] : memref<1x8x128xf32, #tpu.memory_space<vmem>>, vector<1x8x128xf32>
    tpu.vector_store %arg6[%c0_53, %c0_54, %c0_55], %173 {strides = array<i32>} : memref<1x8x128xf32, #tpu.memory_space<vmem>>, vector<1x8x128xf32>,
    return
  }
  func.func @transform_0(%arg0: i32) -> (i32, i32) {
    %c0_i32 = arith.constant 0 : i32
    %c0_i32_0 = arith.constant 0 : i32
    return %c0_i32, %arg0 : i32, i32
  }
  func.func @transform_1(%arg0: i32) -> (i32, i32) {
    %c0_i32 = arith.constant 0 : i32
    %c0_i32_0 = arith.constant 0 : i32
    return %c0_i32, %arg0 : i32, i32
  }
  func.func @transform_2(%arg0: i32) -> (i32, i32) {
    %c0_i32 = arith.constant 0 : i32
    %c0_i32_0 = arith.constant 0 : i32
    return %c0_i32, %arg0 : i32, i32
  }
  func.func @transform_3(%arg0: i32) -> (i32, i32) {
    %c0_i32 = arith.constant 0 : i32
    %c0_i32_0 = arith.constant 0 : i32
    return %c0_i32, %arg0 : i32, i32
  }
  func.func @transform_4(%arg0: i32) -> (i32, i32, i32) {
    %c0_i32 = arith.constant 0 : i32
    %c0_i32_0 = arith.constant 0 : i32
    %c0_i32_1 = arith.constant 0 : i32
    return %arg0, %c0_i32, %c0_i32_0 : i32, i32, i32
  }
  func.func @transform_5(%arg0: i32) -> (i32, i32, i32) {
    %c0_i32 = arith.constant 0 : i32
    %c0_i32_0 = arith.constant 0 : i32
    %c0_i32_1 = arith.constant 0 : i32
    return %arg0, %c0_i32, %c0_i32_0 : i32, i32, i32
  }
}

</mosaic_0001>

<bundles_post_ra>
// kernel: tpu_custom_call.1
= control target key start
LH: loop header
LB: loop body
LE: loop exit
PB: predicated region body
PF: predicated region fallthrough
CT: control target
= control target key end

     0   :  { %11 = vsyncpa [#allocation3], 0  ;;  %v103_v3 = vlaneseq  ;;  %v288_v4 = vmov 0   ;;  %v465_v7 = vmov 0  ;;  %s459_s0 = inlined_call_operand.vmem [shape: f32[6,8], index: 0, kind: input, shape index: {}]   ;;  %s460_s1 = inlined_call_operand.vmem [shape: s32[16,8], index: 1, kind: input, shape index: {}]   ;;  %s461_s2 = inlined_call_operand.vmem [shape: s32[8,8], index: 2, kind: input, shape index: {}]   ;;  %s462_s3 = inlined_call_operand.hbm [shape: f32[6,8], index: 3, kind: output, shape index: {0}]   ;;  %s463_s4 = inlined_call_operand.hbm [shape: f32[1,8,128], index: 4, kind: output, shape index: {1}]   ;;  %s464_s5 = inlined_call_operand.hbm [shape: f32[1,8,128], index: 5, kind: output, shape index: {2}]  }
   0x1   :  { %v20_v0 = vld [vmem:[%s460_s1] sm:$0xff]  ;;  %v21_v1 = vld [vmem:[%s460_s1 + $0x8] sm:$0xff] }
   0x2   :  { %vm23_vm0 = vcmp.ge.s32.totalorder %v20_v0, 22  ;;  %vm24_vm1 = vcmp.ge.s32.totalorder %v21_v1, 22  ;;  %vm25_vm2 = vcmp.le.s32.totalorder %v20_v0, 23  ;;  %vm26_vm3 = vcmp.le.s32.totalorder %v21_v1, 23  ;;  %v22_v2 = vld [vmem:[%s461_s2] sm:$0xff] }
   0x3   :  { %vm27_vm4 = vmand %vm23_vm0, %vm25_vm2  ;;  %vm31_vm5 = vcmp.ge.s32.totalorder %v20_v0, 0  ;;  %vm32_vm6 = vcmp.ge.s32.totalorder %v21_v1, 0  ;;  %vm33_vm7 = vcmp.le.s32.totalorder %v20_v0, 1  ;;  %vm34_vm8 = vcmp.le.s32.totalorder %v21_v1, 1 }
   0x4   :  { %vm28_vm9 = vmand %vm24_vm1, %vm26_vm3  ;;  %vm37_vm10 = vcmp.ge.s32.totalorder %v20_v0, 14  ;;  %vm39_vm11 = vcmp.le.s32.totalorder %v20_v0, 21  ;;  %v29_v5 = vsel %vm27_vm4, 1, %v288_v4  ;;  %vm38_vm13 = vcmp.ge.s32.totalorder %v21_v1, 14 }
   0x5   :  { %v30_v6 = vsel %vm28_vm9, 1, %v288_v4  ;;  %vm334_vm12 = vmand %vm31_vm5, %vm33_vm7  ;;  %vm40_vm14 = vcmp.le.s32.totalorder %v21_v1, 21  ;;  %vm49_vm0 = vcmp.ge.s32.totalorder %v20_v0, 6  ;;  %vm51_vm2 = vcmp.le.s32.totalorder %v20_v0, 13 }
   0x6   :  { %v466_v7 = vsel %vm334_vm12, 4294967295, %v465_v7  ;;  %vm338_vm15 = vmand %vm32_vm6, %vm34_vm8  ;;  %vm59_vm9 = vcmp.ge.s32.totalorder %v20_v0, 4  ;;  %vm79_vm7 = vcmp.eq.s32.totalorder %v22_v2, 1  ;;  %vm81_vm12 = vcmp.eq.s32.totalorder %v22_v2, 2 }
   0x7   :  { %vm342_vm4 = vmand %vm37_vm10, %vm39_vm11  ;;  %v80_v11 = vsel %vm79_vm7, 1, %v288_v4  ;;  %v82_v12 = vsel %vm81_vm12, 32, %v288_v4  ;;  %vm84_vm8 = vcmp.eq.s32.totalorder %v22_v2, 3  ;;  %vm87_vm1 = vcmp.eq.s32.totalorder %v22_v2, 4 }
   0x8   :  { %vm346_vm6 = vmand %vm38_vm13, %vm40_vm14  ;;  %vm473_vm10 = vnez %v466_v7  ;;  %vm61_vm3 = vcmp.le.s32.totalorder %v20_v0, 5  ;;  %v83_v13 = vadd.s32 %v82_v12, %v80_v11  ;;  %v85_v14 = vsel %vm84_vm8, 1024, %v288_v4 }
   0x9   :  { %vm43_vm11 = vmor %vm473_vm10, %vm342_vm4  ;;  %vm90_vm5 = vcmp.eq.s32.totalorder %v22_v2, 5  ;;  %v88_v16 = vsel %vm87_vm1, 32768, %v288_v4  ;;  %vm93_vm12 = vcmp.eq.s32.totalorder %v22_v2, 6  ;;  %v363_v17 = vshrl.u32 %v103_v3, 7 }
   0xa   :  { %vm44_vm13 = vmor %vm338_vm15, %vm346_vm6  ;;  %v45_v15 = vsel %vm43_vm11, 128, %v288_v4  ;;  %vm62_vm4 = vcmp.le.s32.totalorder %v21_v1, 5  ;;  %v86_v20 = vadd.s32 %v85_v14, %v83_v13  ;;  %vm474_vm7 = vcmp.le.s32.totalorder %v21_v1, 13 }
   0xb   :  { %v46_v18 = vsel %vm44_vm13, 128, %v288_v4  ;;  %v47_v19 = vadd.s32 %v45_v15, %v29_v5  ;;  %vm53_vm14 = vmand %vm49_vm0, %vm51_vm2  ;;  %vm475_vm8 = vcmp.ge.s32.totalorder %v21_v1, 6  ;;  %v91_v23 = vsel %vm90_vm5, 1048576, %v288_v4 }
   0xc   :  { %v48_v21 = vadd.s32 %v46_v18, %v30_v6  ;;  %vm54_vm10 = vmand %vm475_vm8, %vm474_vm7  ;;  %v55_v22 = vsel %vm53_vm14, 16384, %v288_v4  ;;  %vm105_vm15 = vcmp.eq.s32.totalorder %v363_v17, 0  ;;  %v89_v26 = vadd.s32 %v88_v16, %v86_v20 }
   0xd   :  { %v56_v24 = vsel %vm54_vm10, 16384, %v288_v4  ;;  %v57_v25 = vadd.s32 %v55_v22, %v47_v19  ;;  %vm63_vm1 = vmand %vm59_vm9, %vm61_vm3  ;;  %v94_v27 = vsel %vm93_vm12, 33554432, %v288_v4  ;;  %vm476_vm0 = vcmp.ge.s32.totalorder %v21_v1, 4 }
   0xe   :  { %v58_v28 = vadd.s32 %v56_v24, %v48_v21  ;;  %vm64_vm2 = vmand %vm476_vm0, %vm62_vm4  ;;  %v65_v29 = vsel %vm63_vm1, 2097152, %v288_v4  ;;  %v106_v30 = vsel %vm105_vm15, 31, %v288_v4  ;;  %vm108_vm5 = vcmp.eq.s32.totalorder %v363_v17, 1 }
   0xf   :  { %v66_v31 = vsel %vm64_vm2, 2097152, %v288_v4  ;;  %v67_v32 = vadd.s32 %v65_v29, %v57_v25  ;;  %v92_v33 = vadd.s32 %v91_v23, %v89_v26 }
  0x10   :  { %12 = vsyncpa [#allocation5], 0  ;;  %v68_v34 = vadd.s32 %v66_v31, %v58_v28  ;;  %vm69_vm3 = vcmask 64512   ;;  %v109_v37 = vsel %vm108_vm5, 992, %v106_v30  ;;  %vm111_vm9 = vcmp.eq.s32.totalorder %v363_v17, 2 }
  0x11   :  { %v70_v35 = vsel %vm69_vm3, %v67_v32, 0  ;;  %v95_v36 = vadd.s32 %v94_v27, %v92_v33  ;;  %v112_v42 = vsel %vm111_vm9, 31744, %v109_v37  ;;  %vm114_vm6 = vcmp.eq.s32.totalorder %v363_v17, 3  ;;  %v19_v50 = vld [vmem:[%s459_s0] sm:$0x3f]  ;;  %s290_s0 = smov [#allocation2]  }
  0x12   :  { %v71_v38 = vsel %vm69_vm3, %v68_v34, 0  ;;  %v115_v45 = vsel %vm114_vm6, 1015808, %v112_v42  ;;  %vm117_vm11 = vcmp.eq.s32.totalorder %v363_v17, 4  ;;  %vm120_vm13 = vcmp.eq.s32.totalorder %v363_v17, 5  ;;  %s170_s24 = sshll.u32 %s290_s0, 4  ;;  %s171_s24 = int_to_ptr.vmem [resolvable:$true] %s170_s24 }
  0x13   :  { %v72_v39 = vadd.s32 %v71_v38, %v70_v35  ;;  %v96_v40 = vsel %vm69_vm3, %v95_v36, 0  ;;  %v118_v49 = vsel %vm117_vm11, 32505856, %v115_v45  ;;  %v107_v52 = vsel %vm105_vm15, 127, %v288_v4  ;;  %s218_s25 = scalar_lea.vmem %s171_s24, 128  ;;  %p223_p1 = scmp.lt.s32.totalorder %s171_s24, %s171_s24 }
  0x14   :  { %v97_v41 = vrot.slane %v96_v40, 4  ;;  %v121_v53 = vsel %vm120_vm13, 1040187392, %v118_v49  ;;  %v110_v56 = vsel %vm108_vm5, 16256, %v107_v52  ;;  %v127_v57 = vsub.f32 1.0, %v19_v50  ;;  %p219_p0 = scmp.ne.s32.totalorder %s171_s24, %s218_s25  ;;  %p224_p2 = scmp.lt.s32.totalorder %s218_s25, %s218_s25 }
  0x15   :  { %v73_v43 = vrot.slane %v72_v39, 4  ;;  %v113_v60 = vsel %vm111_vm9, 16256, %v110_v56  ;;  %vm135_vm4 = vcmask 62464   ;;  %v289_v10 = vmov 0.0  }
  0x16   :  { %v98_v44 = vadd.s32 %v97_v41, %v96_v40  ;;  %v116_v63 = vsel %vm114_vm6, 2080768, %v113_v60  ;;  %p225_p3 = por %p224_p2, %p223_p1 }
  0x17   :  { %v74_v47 = vadd.s32 %v73_v43, %v72_v39  ;;  %v119_v1 = vsel %vm117_vm11, 2080768, %v116_v63 }
  0x18   :  { %v99_v46 = vrot.slane %v98_v44, 2  ;;  %v122_v3 = vsel %vm120_vm13, 266338304, %v119_v1  ;;  %p226_p4 = pnand %p225_p3, %p219_p0 }
  0x19   :  { %v75_v54 = vrot.slane %v74_v47, 2 }
  0x1a   :  { %v100_v48 = vadd.s32 %v99_v46, %v98_v44 }
  0x1b   :  { %v76_v59 = vadd.s32 %v75_v54, %v74_v47 }
  0x1c   :  { %v101_v51 = vrot.slane %v100_v48, 1 }
  0x1d   :  { %v77_v0 = vrot.slane %v76_v59, 1 }
  0x1e   :  { %v102_v55 = vadd.s32 %v101_v51, %v100_v48 }
  0x1f   :  { %v78_v2 = vadd.s32 %v77_v0, %v76_v59 }
  0x20   :  { %v123_v58 = vand.u32 %v121_v53, %v102_v55 }
  0x21   :  { %v125_v5 = vand.u32 %v122_v3, %v78_v2 }
  0x22   :  { %vm409_vm12 = vcmp.ne.s32.totalorder %v123_v58, 0 }
  0x23   :  { %v128_v62 = vsel %vm409_vm12, %v19_v50, %v127_v57  ;;  %vm126_vm14 = vcmp.ne.s32.totalorder %v125_v5, 0  ;;  %v205_v14 = vsel %vm409_vm12, 1.0, %v289_v10 }
  0x24   :  { %216 = vlog2.f32 %v128_v62  ;;  %v206_v11 = vsel %vm126_vm14, 1.0, %v289_v10  ;;  %136 = vst.msk [vmem:[#allocation2] sm:$0x3f] %vm135_vm4, %v205_v14 }
  0x25   :  { %v150_v13 = vsel %vm135_vm4, %v206_v11, 0.0 }
  0x2e   :  { %v217_v4 = vpop.eup %216 }
  0x2f   :  { %v130_v6 = vmul.f32 0.6931472, %v217_v4 }
  0x31   :  { %v131_v7 = vmax.f32 %v130_v6, -100.0 }
  0x33   :  { %v132_v8 = vsub.f32 0.0, %v131_v7 }
  0x35   :  { %v137_v9 = vsel %vm126_vm14, %v132_v8, 0.0 }
  0x36   :  { %v138_v12 = vsel %vm135_vm4, %v137_v9, 0.0 }
  0x37   :  { %139 = vadd.xlane.f32.xlu0 %v138_v12 }
  0x3b   :  { %151 = vadd.xlane.f32.xlu0 %v150_v13 }
  0x3c   :  { %229 = shalt.err (!%p226_p4)
}
  0x3d   :  { %s230_s28 = scalar_lea.hbm %s462_s3, 128 }
  0x3e   :  { %p231_p5 = scmp.ne.s32.totalorder %s462_s3, %s230_s28  ;;  %p234_p6 = scmp.lt.u32.totalorder %s230_s28, %s462_s3 }
  0x40   :  { %p236_p7 = pnand %p234_p6, %p231_p5 }
  0x42   :  { %239 = shalt.err (!%p236_p7)
}
  0x43   :  { %173 = dma.vmem_to_hbm [thread:$0]  %s171_s24, 128, %s462_s3, [#allocation3]  }
  0x44   :  { %s291_s10 = smov [#allocation4]   ;;  %s292_s3 = smov [#allocation6]  }
  0x45   :  { %s180_s11 = sshll.u32 %s291_s10, 4  ;;  %s190_s13 = sshll.u32 %s292_s3, 4  ;;  %s181_s11 = int_to_ptr.vmem [resolvable:$true] %s180_s11  ;;  %s191_s13 = int_to_ptr.vmem [resolvable:$true] %s190_s13 }
  0x46   :  { %s240_s14 = scalar_lea.vmem %s181_s11, 128  ;;  %p245_p9 = scmp.lt.s32.totalorder %s181_s11, %s181_s11 }
  0x47   :  { %p241_p8 = scmp.ne.s32.totalorder %s181_s11, %s240_s14  ;;  %p246_p10 = scmp.lt.s32.totalorder %s240_s14, %s240_s14 }
  0x49   :  { %p247_p11 = por %p246_p10, %p245_p9 }
  0x4b   :  { %p248_p12 = pnand %p247_p11, %p241_p8 }
  0xc4   :  { %v140_v15 = vpop.xlane.xlu0 %139 }
  0xc5   :  { %v141_v16 = vrot.slane %v140_v15, 4 }
  0xc7   :  { %v142_v17 = vadd.f32 %v141_v16, %v140_v15 }
  0xc8   :  { %v152_v18 = vpop.xlane.xlu0 %151 }
  0xc9   :  { %v143_v19 = vrot.slane %v142_v17, 2  ;;  %v153_v20 = vrot.slane %v152_v18, 4 }
  0xcb   :  { %v154_v21 = vadd.f32 %v153_v20, %v152_v18  ;;  %v144_v22 = vadd.f32 %v143_v19, %v142_v17 }
  0xcd   :  { %v155_v23 = vrot.slane %v154_v21, 2  ;;  %v145_v24 = vrot.slane %v144_v22, 1 }
  0xcf   :  { %v156_v25 = vadd.f32 %v155_v23, %v154_v21  ;;  %v146_v26 = vadd.f32 %v145_v24, %v144_v22 }
  0xd1   :  { %207 = vpush %v146_v26  ;;  %v157_v27 = vrot.slane %v156_v25, 1 }
  0xd3   :  { %v158_v28 = vadd.f32 %v157_v27, %v156_v25 }
  0xd5   :  { %209 = vpush %v158_v28 }
 0x102   :  { %s208_s12 = spop %207 }
 0x103   :  { %v160_v29 = vstv %s208_s12 }
 0x104   :  { %161 = vst [vmem:[#allocation4] sm:$0xff] %v160_v29 }
 0x105   :  { %251 = shalt.err (!%p248_p12)
}
 0x106   :  { %s252_s17 = scalar_lea.hbm %s463_s4, 128 }
 0x107   :  { %p253_p13 = scmp.ne.s32.totalorder %s463_s4, %s252_s17  ;;  %p256_p0 = scmp.lt.u32.totalorder %s252_s17, %s463_s4 }
 0x109   :  { %p258_p1 = pnand %p256_p0, %p253_p13 }
 0x10b   :  { %261 = shalt.err (!%p258_p1)
}
 0x10c   :  { %183 = dma.vmem_to_hbm [thread:$0]  %s181_s11, 128, %s463_s4, [#allocation5]  }
 0x10d   :  { %s210_s1 = spop %209  ;;  %s262_s2 = scalar_lea.vmem %s191_s13, 128 }
 0x10e   :  { %v162_v30 = vstv %s210_s1  ;;  %p263_p2 = scmp.ne.s32.totalorder %s191_s13, %s262_s2  ;;  %p267_p3 = scmp.lt.s32.totalorder %s191_s13, %s191_s13 }
 0x10f   :  { %163 = vst [vmem:[#allocation6] sm:$0xff] %v162_v30  ;;  %p268_p4 = scmp.lt.s32.totalorder %s262_s2, %s262_s2 }
 0x111   :  { %p269_p5 = por %p268_p4, %p267_p3 }
 0x113   :  { %p270_p6 = pnand %p269_p5, %p263_p2 }
 0x115   :  { %273 = shalt.err (!%p270_p6)
}
 0x116   :  { %s274_s25 = scalar_lea.hbm %s464_s5, 128 }
 0x117   :  { %p275_p7 = scmp.ne.s32.totalorder %s464_s5, %s274_s25  ;;  %p278_p8 = scmp.lt.u32.totalorder %s274_s25, %s464_s5 }
 0x119   :  { %p280_p9 = pnand %p278_p8, %p275_p7 }
 0x11b   :  { %283 = shalt.err (!%p280_p9)
}
 0x11c   :  { %193 = dma.vmem_to_hbm [thread:$0]  %s191_s13, 128, %s464_s5, [#allocation5]  }
 0x11d   :  { %284 = dma.done.wait [#allocation3], 128  }
 0x11e   :  { %285 = vsyncadd [#allocation3], 4294967168 }
 0x11f   :  { %286 = dma.done.wait [#allocation5], 256  }
 0x120   :  { %287 = vsyncadd [#allocation5], 4294967040 }
 0x121   :  { %203 = vsyncpa [#allocation3], 1 }
 0x122   :  { %204 = vsyncpa [#allocation5], 1 }

</bundles_post_ra>
